<compile_context>
chip_gen: v7x
topology: tpu7x:2x2x1
jax: 0.10.0
libtpu: 0.0.40
codegen_flags: <defaults>
</compile_context>

<pallas_src>
import functools

import jax
import jax.numpy as jnp
from jax.experimental import pallas as pl
from jax.experimental.pallas import tpu as pltpu


def _attention_kernel(x_ref, wqkv_ref, bqkv_ref, wproj_ref, bproj_ref, o_ref,
                      ctx_ref, *, n_heads: int, head_dim: int):
    in_dtype = x_ref.dtype
    D = n_heads * head_dim

    x = x_ref[0]                                           # (S, D) native dtype

    # QKV projection (scale already folded into the Q columns of Wqkv/bqkv):
    # native-dtype MXU inputs, f32 accumulation, single downcast of the result.
    qkv = jnp.dot(x, wqkv_ref[...], preferred_element_type=jnp.float32)
    qkv = (qkv + bqkv_ref[...].astype(jnp.float32)).astype(in_dtype)   # (S, 3D)

    # Per-head attention, writing each head's context into the (S, D) scratch.
    # NOTE: with head_dim < 128 these column slices cross (8,128) lane tiles;
    # at ViT head dims the relayout is minor next to the matmuls.
    for h in range(n_heads):
        lo = h * head_dim
        qh = qkv[:, lo:lo + head_dim]                      # (S, hd) (pre-scaled)
        kh = qkv[:, D + lo:D + lo + head_dim]              # (S, hd)
        vh = qkv[:, 2 * D + lo:2 * D + lo + head_dim]      # (S, hd)

        # q @ k^T via contraction over the last dims (MXU trans_b, no XLU .T).
        s = jax.lax.dot_general(qh, kh, (((1,), (1,)), ((), ())),
                                preferred_element_type=jnp.float32)    # (S, S) f32

        # Numerically-stable softmax numerator in f32; the normalization is
        # applied after p @ v so only S*hd elements get scaled (not S*S).
        s = s - jnp.max(s, axis=-1, keepdims=True)
        p = jnp.exp(s)
        denom = jnp.sum(p, axis=-1, keepdims=True)                     # (S, 1) f32

        ctx = jnp.dot(p.astype(in_dtype), vh,
                      preferred_element_type=jnp.float32)              # (S, hd) f32
        ctx = ctx * pl.reciprocal(denom, approx=True)                  # EUP slot
        ctx_ref[:, lo:lo + head_dim] = ctx.astype(in_dtype)

    # Single full-MXU-depth (S, D) @ (D, D) output projection GEMM + bias,
    # written once as a lane-dense (S, D) slab.
    out = jnp.dot(ctx_ref[...], wproj_ref[...], preferred_element_type=jnp.float32)
    out = out + bproj_ref[...].astype(jnp.float32)
    o_ref[0] = out.astype(o_ref.dtype)


def _vmem_limit_bytes() -> int:
    """Generation-aware VMEM cap: ~75% of physical, capped at 100 MiB.

    ~96 MiB on v5e/v6e (128 MiB physical), ~48 MiB on v7x (64 MiB physical).
    """
    cap = 64 * 1024 * 1024  # conservative default (v7x physical VMEM)
    try:
        info = pltpu.get_tpu_info()
        for attr in ("vmem_capacity_bytes", "vmem_size_bytes", "vmem_bytes"):
            v = getattr(info, attr, None)
            if v:
                cap = int(v)
                break
    except Exception:
        pass
    return min(cap * 3 // 4, 100 * 1024 * 1024)


def attention_pallas(x, w_qkv, b_qkv, w_proj, b_proj, *, n_heads):
    B, S, D = x.shape
    head_dim = D // n_heads
    scale = head_dim ** (-0.5)

    # Fold the 1/sqrt(head_dim) scale into the Q output columns of the QKV
    # projection host-side (zero kernel cost: removes H*S*hd VPU multiplies
    # per grid step).
    col_scale = jnp.concatenate([
        jnp.full((D,), scale, dtype=jnp.float32),
        jnp.ones((2 * D,), dtype=jnp.float32)])
    w_qkv_s = (w_qkv.astype(jnp.float32) * col_scale).astype(w_qkv.dtype)
    b_qkv_s = (b_qkv.astype(jnp.float32) * col_scale).astype(b_qkv.dtype)

    kernel = functools.partial(
        _attention_kernel, n_heads=n_heads, head_dim=head_dim)

    # Advisory cost estimate so XLA can schedule around this custom call.
    flops = 2 * B * (S * D * 3 * D + 2 * n_heads * S * S * head_dim + S * D * D)
    transcendentals = B * n_heads * S * S                  # the exp() calls
    bytes_accessed = int(
        x.size * x.dtype.itemsize
        + w_qkv.size * w_qkv.dtype.itemsize
        + b_qkv.size * b_qkv.dtype.itemsize
        + w_proj.size * w_proj.dtype.itemsize
        + b_proj.size * b_proj.dtype.itemsize
        + B * S * D * x.dtype.itemsize)

    return pl.pallas_call(
        kernel,
        out_shape=jax.ShapeDtypeStruct((B, S, D), x.dtype),
        grid_spec=pltpu.PrefetchScalarGridSpec(
            num_scalar_prefetch=0,
            grid=(B,),
            in_specs=[
                pl.BlockSpec((1, S, D), lambda b: (b, 0, 0)),       # x
                pl.BlockSpec((D, 3 * D), lambda b: (0, 0)),         # w_qkv (grid-invariant)
                pl.BlockSpec((1, 3 * D), lambda b: (0, 0)),         # b_qkv
                pl.BlockSpec((D, D), lambda b: (0, 0)),             # w_proj
                pl.BlockSpec((1, D), lambda b: (0, 0)),             # b_proj
            ],
            out_specs=pl.BlockSpec((1, S, D), lambda b: (b, 0, 0)),
            scratch_shapes=[pltpu.VMEM((S, D), x.dtype)],           # per-head ctx slab
        ),
        compiler_params=pltpu.CompilerParams(
            dimension_semantics=("parallel",),
            vmem_limit_bytes=_vmem_limit_bytes(),
        ),
        cost_estimate=pl.CostEstimate(
            flops=flops,
            transcendentals=transcendentals,
            bytes_accessed=bytes_accessed),
    )(x, w_qkv_s, b_qkv_s, w_proj, b_proj)


def attention_ref(x, w_qkv, b_qkv, w_proj, b_proj, *, n_heads):
    """Pure-JAX reference mirroring the PyTorch forward."""
    B, S, D = x.shape
    hd = D // n_heads
    scale = hd ** (-0.5)
    qkv = x @ w_qkv + b_qkv                                 # (B, S, 3D)
    qkv = qkv.reshape(B, S, 3, n_heads, hd)
    qkv = jnp.transpose(qkv, (2, 0, 3, 1, 4))               # (3, B, H, S, hd)
    q, k, v = qkv[0], qkv[1], qkv[2]
    dp = jnp.einsum("bhqd,bhkd->bhqk", q, k) * scale
    attn = jax.nn.softmax(dp, axis=-1)
    wa = jnp.einsum("bhqk,bhkd->bhqd", attn, v)             # (B, H, S, hd)
    wa = jnp.transpose(wa, (0, 2, 1, 3)).reshape(B, S, D)
    return wa @ w_proj + b_proj


if __name__ == "__main__":
    B, S, DIM, N_HEADS = 2, 8, 32, 4

    key = jax.random.PRNGKey(0)
    kx, k1, k2, k3, k4 = jax.random.split(key, 5)

    x = jax.random.normal(kx, (B, S, DIM), dtype=jnp.float32)
    # Deterministic synthetic parameters (nn.Linear(dim, 3*dim) / nn.Linear(dim, dim)),
    # stored as (in, out).
    w_qkv = jax.random.normal(k1, (DIM, 3 * DIM), dtype=jnp.float32) * 0.05
    b_qkv = jax.random.normal(k2, (1, 3 * DIM), dtype=jnp.float32) * 0.05
    w_proj = jax.random.normal(k3, (DIM, DIM), dtype=jnp.float32) * 0.05
    b_proj = jax.random.normal(k4, (1, DIM), dtype=jnp.float32) * 0.05

    # --- float32 path (approx reciprocal is the only deviation from the reference) ---
    out = attention_pallas(x, w_qkv, b_qkv, w_proj, b_proj, n_heads=N_HEADS)
    out = jax.block_until_ready(out)
    ref = attention_ref(x, w_qkv, b_qkv, w_proj, b_proj, n_heads=N_HEADS)
    assert jnp.allclose(out, ref, atol=1e-2, rtol=1e-2), "f32 mismatch vs reference"

    # --- bf16 path: native MXU inputs with f32 accumulation + f32 softmax ---
    xb, wqb, bqb, wpb, bpb = (a.astype(jnp.bfloat16)
                              for a in (x, w_qkv, b_qkv, w_proj, b_proj))
    out_bf = attention_pallas(xb, wqb, bqb, wpb, bpb, n_heads=N_HEADS)
    out_bf = jax.block_until_ready(out_bf)
    ref_bf = attention_ref(*(a.astype(jnp.float32) for a in (xb, wqb, bqb, wpb, bpb)),
                           n_heads=N_HEADS)
    assert jnp.allclose(out_bf.astype(jnp.float32), ref_bf, atol=5e-2, rtol=5e-2), \
        "bf16 mismatch vs reference"

    print("KERNEL_OK")
</pallas_src>

<mosaic_0001>
module attributes {stable_mosaic.version = 11 : i64} {
  func.func @_attention_kernel(%arg0: i32, %arg1: memref<1x8x32xf32, #tpu.memory_space<vmem>>, %arg2: memref<32x96xf32, #tpu.memory_space<vmem>>, %arg3: memref<1x96xf32, #tpu.memory_space<vmem>>, %arg4: memref<32x32xf32, #tpu.memory_space<vmem>>, %arg5: memref<1x32xf32, #tpu.memory_space<vmem>>, %arg6: memref<1x8x32xf32, #tpu.memory_space<vmem>>, %arg7: memref<8x32xf32, #tpu.memory_space<vmem>>) attributes {dimension_semantics = [#tpu.dimension_semantics<parallel>], iteration_bounds = array<i64: 2>, scalar_prefetch = 0 : i64, scratch_operands = 1 : i64, tpu.core_type = #tpu.core_type<tc>, window_params = [{transform_indices = @transform_0, window_bounds = array<i64: 1, 8, 32>}, {pipeline_mode = #tpu.pipeline_mode<synchronous>, transform_indices = @transform_1, window_bounds = array<i64: 32, 96>}, {pipeline_mode = #tpu.pipeline_mode<synchronous>, transform_indices = @transform_2, window_bounds = array<i64: 1, 96>}, {pipeline_mode = #tpu.pipeline_mode<synchronous>, transform_indices = @transform_3, window_bounds = array<i64: 32, 32>}, {pipeline_mode = #tpu.pipeline_mode<synchronous>, transform_indices = @transform_4, window_bounds = array<i64: 1, 32>}, {transform_indices = @transform_5, window_bounds = array<i64: 1, 8, 32>}]} {
    %c0 = arith.constant 0 : index
    %c0_0 = arith.constant 0 : index
    %c0_1 = arith.constant 0 : index
    %0 = vector.load %arg1[%c0, %c0_0, %c0_1] : memref<1x8x32xf32, #tpu.memory_space<vmem>>, vector<1x8x32xf32>
    %1 = vector.shape_cast %0 : vector<1x8x32xf32> to vector<8x32xf32>
    %c0_2 = arith.constant 0 : index
    %c0_3 = arith.constant 0 : index
    %2 = vector.load %arg2[%c0_2, %c0_3] : memref<32x96xf32, #tpu.memory_space<vmem>>, vector<32x96xf32>
    %cst = arith.constant dense<0.000000e+00> : vector<8x96xf32>
    %3 = tpu.matmul %1, %2, %cst {dimension_numbers = #tpu.dot_dimension_numbers<[1], [0], [0], [1], [0, 0, 1, 1], [], []>} : vector<8x32xf32>, vector<32x96xf32>, vector<8x96xf32> -> vector<8x96xf32>
    %c0_4 = arith.constant 0 : index
    %c0_5 = arith.constant 0 : index
    %4 = vector.load %arg3[%c0_4, %c0_5] : memref<1x96xf32, #tpu.memory_space<vmem>>, vector<1x96xf32>
    %5 = vector.broadcast %4 : vector<1x96xf32> to vector<8x96xf32>
    %6 = arith.addf %3, %5 : vector<8x96xf32>
    %7 = vector.extract_strided_slice %6 {offsets = [0, 0], sizes = [8, 8], strides = [1, 1]} : vector<8x96xf32> to vector<8x8xf32>
    %8 = vector.extract_strided_slice %6 {offsets = [0, 32], sizes = [8, 8], strides = [1, 1]} : vector<8x96xf32> to vector<8x8xf32>
    %9 = vector.extract_strided_slice %6 {offsets = [0, 64], sizes = [8, 8], strides = [1, 1]} : vector<8x96xf32> to vector<8x8xf32>
    %cst_6 = arith.constant dense<0.000000e+00> : vector<8x8xf32>
    %10 = tpu.matmul %7, %8, %cst_6 {dimension_numbers = #tpu.dot_dimension_numbers<[1], [1], [0], [0], [0, 0, 1, 0], [], []>} : vector<8x8xf32>, vector<8x8xf32>, vector<8x8xf32> -> vector<8x8xf32>
    %cst_7 = arith.constant dense<0xFF800000> : vector<8xf32>
    %11 = vector.multi_reduction <maximumf>, %10, %cst_7 [1] : vector<8x8xf32> to vector<8xf32>
    %12 = vector.shape_cast %11 : vector<8xf32> to vector<8x1xf32>
    %13 = vector.broadcast %12 : vector<8x1xf32> to vector<8x8xf32>
    %14 = arith.subf %10, %13 : vector<8x8xf32>
    %15 = math.exp %14 : vector<8x8xf32>
    %cst_8 = arith.constant dense<0.000000e+00> : vector<8xf32>
    %16 = vector.multi_reduction <add>, %15, %cst_8 [1] : vector<8x8xf32> to vector<8xf32>
    %17 = vector.shape_cast %16 : vector<8xf32> to vector<8x1xf32>
    %cst_9 = arith.constant dense<0.000000e+00> : vector<8x8xf32>
    %18 = tpu.matmul %15, %9, %cst_9 {dimension_numbers = #tpu.dot_dimension_numbers<[1], [0], [0], [1], [0, 0, 1, 1], [], []>} : vector<8x8xf32>, vector<8x8xf32>, vector<8x8xf32> -> vector<8x8xf32>
    %19 = tpu.reciprocal %17 {approx = true} : vector<8x1xf32> -> vector<8x1xf32>
    %20 = vector.broadcast %19 : vector<8x1xf32> to vector<8x8xf32>
    %21 = arith.mulf %18, %20 : vector<8x8xf32>
    %c0_10 = arith.constant 0 : index
    %c0_11 = arith.constant 0 : index
    %22 = vector.load %arg7[%c0_10, %c0_11] : memref<8x32xf32, #tpu.memory_space<vmem>>, vector<8x8xf32>
    tpu.vector_store %arg7[%c0_10, %c0_11], %21 {strides = array<i32>} : memref<8x32xf32, #tpu.memory_space<vmem>>, vector<8x8xf32>,
    %23 = vector.extract_strided_slice %6 {offsets = [0, 8], sizes = [8, 8], strides = [1, 1]} : vector<8x96xf32> to vector<8x8xf32>
    %24 = vector.extract_strided_slice %6 {offsets = [0, 40], sizes = [8, 8], strides = [1, 1]} : vector<8x96xf32> to vector<8x8xf32>
    %25 = vector.extract_strided_slice %6 {offsets = [0, 72], sizes = [8, 8], strides = [1, 1]} : vector<8x96xf32> to vector<8x8xf32>
    %cst_12 = arith.constant dense<0.000000e+00> : vector<8x8xf32>
    %26 = tpu.matmul %23, %24, %cst_12 {dimension_numbers = #tpu.dot_dimension_numbers<[1], [1], [0], [0], [0, 0, 1, 0], [], []>} : vector<8x8xf32>, vector<8x8xf32>, vector<8x8xf32> -> vector<8x8xf32>
    %cst_13 = arith.constant dense<0xFF800000> : vector<8xf32>
    %27 = vector.multi_reduction <maximumf>, %26, %cst_13 [1] : vector<8x8xf32> to vector<8xf32>
    %28 = vector.shape_cast %27 : vector<8xf32> to vector<8x1xf32>
    %29 = vector.broadcast %28 : vector<8x1xf32> to vector<8x8xf32>
    %30 = arith.subf %26, %29 : vector<8x8xf32>
    %31 = math.exp %30 : vector<8x8xf32>
    %cst_14 = arith.constant dense<0.000000e+00> : vector<8xf32>
    %32 = vector.multi_reduction <add>, %31, %cst_14 [1] : vector<8x8xf32> to vector<8xf32>
    %33 = vector.shape_cast %32 : vector<8xf32> to vector<8x1xf32>
    %cst_15 = arith.constant dense<0.000000e+00> : vector<8x8xf32>
    %34 = tpu.matmul %31, %25, %cst_15 {dimension_numbers = #tpu.dot_dimension_numbers<[1], [0], [0], [1], [0, 0, 1, 1], [], []>} : vector<8x8xf32>, vector<8x8xf32>, vector<8x8xf32> -> vector<8x8xf32>
    %35 = tpu.reciprocal %33 {approx = true} : vector<8x1xf32> -> vector<8x1xf32>
    %36 = vector.broadcast %35 : vector<8x1xf32> to vector<8x8xf32>
    %37 = arith.mulf %34, %36 : vector<8x8xf32>
    %c0_16 = arith.constant 0 : index
    %c8 = arith.constant 8 : index
    %38 = vector.load %arg7[%c0_16, %c8] : memref<8x32xf32, #tpu.memory_space<vmem>>, vector<8x8xf32>
    tpu.vector_store %arg7[%c0_16, %c8], %37 {strides = array<i32>} : memref<8x32xf32, #tpu.memory_space<vmem>>, vector<8x8xf32>,
    %39 = vector.extract_strided_slice %6 {offsets = [0, 16], sizes = [8, 8], strides = [1, 1]} : vector<8x96xf32> to vector<8x8xf32>
    %40 = vector.extract_strided_slice %6 {offsets = [0, 48], sizes = [8, 8], strides = [1, 1]} : vector<8x96xf32> to vector<8x8xf32>
    %41 = vector.extract_strided_slice %6 {offsets = [0, 80], sizes = [8, 8], strides = [1, 1]} : vector<8x96xf32> to vector<8x8xf32>
    %cst_17 = arith.constant dense<0.000000e+00> : vector<8x8xf32>
    %42 = tpu.matmul %39, %40, %cst_17 {dimension_numbers = #tpu.dot_dimension_numbers<[1], [1], [0], [0], [0, 0, 1, 0], [], []>} : vector<8x8xf32>, vector<8x8xf32>, vector<8x8xf32> -> vector<8x8xf32>
    %cst_18 = arith.constant dense<0xFF800000> : vector<8xf32>
    %43 = vector.multi_reduction <maximumf>, %42, %cst_18 [1] : vector<8x8xf32> to vector<8xf32>
    %44 = vector.shape_cast %43 : vector<8xf32> to vector<8x1xf32>
    %45 = vector.broadcast %44 : vector<8x1xf32> to vector<8x8xf32>
    %46 = arith.subf %42, %45 : vector<8x8xf32>
    %47 = math.exp %46 : vector<8x8xf32>
    %cst_19 = arith.constant dense<0.000000e+00> : vector<8xf32>
    %48 = vector.multi_reduction <add>, %47, %cst_19 [1] : vector<8x8xf32> to vector<8xf32>
    %49 = vector.shape_cast %48 : vector<8xf32> to vector<8x1xf32>
    %cst_20 = arith.constant dense<0.000000e+00> : vector<8x8xf32>
    %50 = tpu.matmul %47, %41, %cst_20 {dimension_numbers = #tpu.dot_dimension_numbers<[1], [0], [0], [1], [0, 0, 1, 1], [], []>} : vector<8x8xf32>, vector<8x8xf32>, vector<8x8xf32> -> vector<8x8xf32>
    %51 = tpu.reciprocal %49 {approx = true} : vector<8x1xf32> -> vector<8x1xf32>
    %52 = vector.broadcast %51 : vector<8x1xf32> to vector<8x8xf32>
    %53 = arith.mulf %50, %52 : vector<8x8xf32>
    %c0_21 = arith.constant 0 : index
    %c16 = arith.constant 16 : index
    %54 = vector.load %arg7[%c0_21, %c16] : memref<8x32xf32, #tpu.memory_space<vmem>>, vector<8x8xf32>
    tpu.vector_store %arg7[%c0_21, %c16], %53 {strides = array<i32>} : memref<8x32xf32, #tpu.memory_space<vmem>>, vector<8x8xf32>,
    %55 = vector.extract_strided_slice %6 {offsets = [0, 24], sizes = [8, 8], strides = [1, 1]} : vector<8x96xf32> to vector<8x8xf32>
    %56 = vector.extract_strided_slice %6 {offsets = [0, 56], sizes = [8, 8], strides = [1, 1]} : vector<8x96xf32> to vector<8x8xf32>
    %57 = vector.extract_strided_slice %6 {offsets = [0, 88], sizes = [8, 8], strides = [1, 1]} : vector<8x96xf32> to vector<8x8xf32>
    %cst_22 = arith.constant dense<0.000000e+00> : vector<8x8xf32>
    %58 = tpu.matmul %55, %56, %cst_22 {dimension_numbers = #tpu.dot_dimension_numbers<[1], [1], [0], [0], [0, 0, 1, 0], [], []>} : vector<8x8xf32>, vector<8x8xf32>, vector<8x8xf32> -> vector<8x8xf32>
    %cst_23 = arith.constant dense<0xFF800000> : vector<8xf32>
    %59 = vector.multi_reduction <maximumf>, %58, %cst_23 [1] : vector<8x8xf32> to vector<8xf32>
    %60 = vector.shape_cast %59 : vector<8xf32> to vector<8x1xf32>
    %61 = vector.broadcast %60 : vector<8x1xf32> to vector<8x8xf32>
    %62 = arith.subf %58, %61 : vector<8x8xf32>
    %63 = math.exp %62 : vector<8x8xf32>
    %cst_24 = arith.constant dense<0.000000e+00> : vector<8xf32>
    %64 = vector.multi_reduction <add>, %63, %cst_24 [1] : vector<8x8xf32> to vector<8xf32>
    %65 = vector.shape_cast %64 : vector<8xf32> to vector<8x1xf32>
    %cst_25 = arith.constant dense<0.000000e+00> : vector<8x8xf32>
    %66 = tpu.matmul %63, %57, %cst_25 {dimension_numbers = #tpu.dot_dimension_numbers<[1], [0], [0], [1], [0, 0, 1, 1], [], []>} : vector<8x8xf32>, vector<8x8xf32>, vector<8x8xf32> -> vector<8x8xf32>
    %67 = tpu.reciprocal %65 {approx = true} : vector<8x1xf32> -> vector<8x1xf32>
    %68 = vector.broadcast %67 : vector<8x1xf32> to vector<8x8xf32>
    %69 = arith.mulf %66, %68 : vector<8x8xf32>
    %c0_26 = arith.constant 0 : index
    %c24 = arith.constant 24 : index
    %70 = vector.load %arg7[%c0_26, %c24] : memref<8x32xf32, #tpu.memory_space<vmem>>, vector<8x8xf32>
    tpu.vector_store %arg7[%c0_26, %c24], %69 {strides = array<i32>} : memref<8x32xf32, #tpu.memory_space<vmem>>, vector<8x8xf32>,
    %c0_27 = arith.constant 0 : index
    %c0_28 = arith.constant 0 : index
    %71 = vector.load %arg7[%c0_27, %c0_28] : memref<8x32xf32, #tpu.memory_space<vmem>>, vector<8x32xf32>
    %c0_29 = arith.constant 0 : index
    %c0_30 = arith.constant 0 : index
    %72 = vector.load %arg4[%c0_29, %c0_30] : memref<32x32xf32, #tpu.memory_space<vmem>>, vector<32x32xf32>
    %cst_31 = arith.constant dense<0.000000e+00> : vector<8x32xf32>
    %73 = tpu.matmul %71, %72, %cst_31 {dimension_numbers = #tpu.dot_dimension_numbers<[1], [0], [0], [1], [0, 0, 1, 1], [], []>} : vector<8x32xf32>, vector<32x32xf32>, vector<8x32xf32> -> vector<8x32xf32>
    %c0_32 = arith.constant 0 : index
    %c0_33 = arith.constant 0 : index
    %74 = vector.load %arg5[%c0_32, %c0_33] : memref<1x32xf32, #tpu.memory_space<vmem>>, vector<1x32xf32>
    %75 = vector.broadcast %74 : vector<1x32xf32> to vector<8x32xf32>
    %76 = arith.addf %73, %75 : vector<8x32xf32>
    %c0_34 = arith.constant 0 : index
    %c0_35 = arith.constant 0 : index
    %c0_36 = arith.constant 0 : index
    %77 = vector.load %arg6[%c0_34, %c0_35, %c0_36] : memref<1x8x32xf32, #tpu.memory_space<vmem>>, vector<1x8x32xf32>
    %78 = vector.shape_cast %77 : vector<1x8x32xf32> to vector<8x32xf32>
    %79 = vector.shape_cast %76 : vector<8x32xf32> to vector<1x8x32xf32>
    tpu.vector_store %arg6[%c0_34, %c0_35, %c0_36], %79 {strides = array<i32>} : memref<1x8x32xf32, #tpu.memory_space<vmem>>, vector<1x8x32xf32>,
    return
  }
  func.func @transform_0(%arg0: i32) -> (i32, i32, i32) {
    %c0_i32 = arith.constant 0 : i32
    %c0_i32_0 = arith.constant 0 : i32
    %c0_i32_1 = arith.constant 0 : i32
    return %arg0, %c0_i32, %c0_i32_0 : i32, i32, i32
  }
  func.func @transform_1(%arg0: i32) -> (i32, i32) {
    %c0_i32 = arith.constant 0 : i32
    %c0_i32_0 = arith.constant 0 : i32
    %c0_i32_1 = arith.constant 0 : i32
    return %c0_i32, %c0_i32_0 : i32, i32
  }
  func.func @transform_2(%arg0: i32) -> (i32, i32) {
    %c0_i32 = arith.constant 0 : i32
    %c0_i32_0 = arith.constant 0 : i32
    %c0_i32_1 = arith.constant 0 : i32
    return %c0_i32, %c0_i32_0 : i32, i32
  }
  func.func @transform_3(%arg0: i32) -> (i32, i32) {
    %c0_i32 = arith.constant 0 : i32
    %c0_i32_0 = arith.constant 0 : i32
    %c0_i32_1 = arith.constant 0 : i32
    return %c0_i32, %c0_i32_0 : i32, i32
  }
  func.func @transform_4(%arg0: i32) -> (i32, i32) {
    %c0_i32 = arith.constant 0 : i32
    %c0_i32_0 = arith.constant 0 : i32
    %c0_i32_1 = arith.constant 0 : i32
    return %c0_i32, %c0_i32_0 : i32, i32
  }
  func.func @transform_5(%arg0: i32) -> (i32, i32, i32) {
    %c0_i32 = arith.constant 0 : i32
    %c0_i32_0 = arith.constant 0 : i32
    %c0_i32_1 = arith.constant 0 : i32
    return %arg0, %c0_i32, %c0_i32_0 : i32, i32, i32
  }
}

</mosaic_0001>

<bundles_post_ra>
// kernel: tpu_custom_call.1
= control target key start
LH: loop header
LB: loop body
LE: loop exit
PB: predicated region body
PF: predicated region fallthrough
CT: control target
= control target key end

     0   :  { %10 = vsyncpa [#allocation4], 0  ;;  %s1977_s0 = inlined_call_operand.hbm [shape: f32[2,8,32], index: 0, kind: input, shape index: {}]   ;;  %s1978_s1 = inlined_call_operand.hbm [shape: f32[32,96], index: 1, kind: input, shape index: {}]   ;;  %s1979_s2 = inlined_call_operand.vmem [shape: f32[1,96], index: 2, kind: input, shape index: {}]   ;;  %s1980_s3 = inlined_call_operand.hbm [shape: f32[32,32], index: 3, kind: input, shape index: {}]   ;;  %s1981_s4 = inlined_call_operand.vmem [shape: f32[1,32], index: 4, kind: input, shape index: {}]   ;;  %s1982_s5 = inlined_call_operand.hbm [shape: f32[2,8,32], index: 5, kind: output, shape index: {}]  }
   0x1   :  { %12 = vsyncpa [#allocation4 + $0x1], 0 }
   0x2   :  { %13 = vsyncpa [#allocation7], 0 }
   0x3   :  { %14 = vsyncpa [#allocation5], 0 }
   0x4   :  { %16 = vsyncpa [#allocation5 + $0x1], 0  ;;  %s1668_s18 = smov 0   ;;  %s1670_s19 = smov 0  }
   0x5   :  { %s1672_s20 = smov 0   ;;  %s1674_s21 = smov 0  }
   0x6 LB: > { %s1689_s22 = sadd.s32 4294967295, %s1613_s21   ;;  %s1223_s23 = sadd.s32 4294967294, %s1613_s21   ;;  %s1613_s21 = sphi %s1674_s21, %s2002_s21   ;;  %s1609_s20 = sphi %s1672_s20, %s2001_s20   ;;  %s1605_s19 = sphi %s1670_s19, %s2000_s19   ;;  %s1601_s18 = sphi %s1668_s18, %s1999_s18  }
   0x7   : > { %p42_p0 = scmp.ne.s32.totalorder %s1605_s19, %s1601_s18  ;;  %p1983_p1 = scmp.eq.s32.totalorder %s1689_s22, 0 }
   0x8   : > { %p156_p3 = scmp.eq.s32.totalorder %s1223_s23, 1  ;;  %p1224_p5 = scmp.ge.s32.totalorder %s1613_s21, 1 }
   0x9   : > { %p1698_p4 = por %p1983_p1, %p42_p0  ;;  %p163_p7 = scmp.lt.s32.totalorder %s1613_s21, 3 }
   0xa   : > { %p1703_p6 = por %p156_p3, %p42_p0  ;;  %s1615_s27 = smov [#allocation6]  }
   0xb   : > { %s1986_s24 = scalar_select %p1698_p4, 1, 0 }
   0xc   : > { %s1987_s25 = scalar_select %p1703_p6, 1, 0 }
   0xd   : > { %p1708_p8 = pnand %p1224_p5, %p163_p7  ;;  %s175_s28 = sshll.u32 %s1615_s27, 4  ;;  %s1712_s28 = int_to_ptr.vmem [resolvable:$true] %s175_s28 }
   0xe   : > { %s1616_s30 = smov [#allocation8]   ;;  %s1457_s9 = scalar_lea.hbm %s1978_s1, 512 }
   0xf   : > { %p1367_p9 = pneg %p1708_p8  ;;  %s191_s6 = sshll.u32 %s1616_s30, 4  ;;  %s1723_s6 = int_to_ptr.vmem [resolvable:$true] %s191_s6 }
  0x10   : > { %p1458_p12 = scmp.ne.s32.totalorder %s1978_s1, %s1457_s9  ;;  %p1464_p5 = scmp.lt.u32.totalorder %s1457_s9, %s1978_s1 }
  0x11   : > { %p1719_p11 = pnand %p1367_p9, %p1983_p1 }
  0x13   : > { %p1459_p13 = pneg %p1719_p11 }
  0x15   : > { %p1460_p0 = pnand %p1459_p13, %p1458_p12 }
  0x17   : > { %p1461_p3 = pneg %p1460_p0 }
  0x19   : > { %p1466_p7 = pnand %p1464_p5, %p1461_p3 }
  0x1b   : > { %1469 = shalt.err (!%p1466_p7)
}
  0x1c   : > { %s1470_s14 = scalar_lea.vmem %s1712_s28, 512  ;;  %p1478_p2 = scmp.lt.s32.totalorder %s1712_s28, %s1712_s28 }
  0x1d   : > { %p1471_p9 = scmp.ne.s32.totalorder %s1712_s28, %s1470_s14  ;;  %p1479_p12 = scmp.lt.s32.totalorder %s1470_s14, %s1470_s14 }
  0x1f   : > { %p1473_p10 = pnand %p1471_p9, %p1459_p13  ;;  %p1480_p0 = por %p1479_p12, %p1478_p2 }
  0x21   : > { %p1474_p1 = pneg %p1473_p10 }
  0x23   : > { %p1481_p6 = pnand %p1480_p0, %p1474_p1 }
  0x25   : > { %1484 = shalt.err (!%p1481_p6)
}
  0x26   : > { %s1617_s15 = smov 128   ;;  %s1618_s16 = smov 8  }
  0x27   : > { %1370 = dma.hbm_to_vmem [thread:$0]  (!%p1719_p11), %s1978_s1, 512, %s1712_s28, [#allocation7], %s1617_s15, %s1617_s15, %s1618_s16  }
  0x28   : > { %s1485_s7 = scalar_lea.hbm %s1980_s3, 512 }
  0x29   : > { %p1486_p2 = scmp.ne.s32.totalorder %s1980_s3, %s1485_s7  ;;  %p1492_p10 = scmp.lt.u32.totalorder %s1485_s7, %s1980_s3 }
  0x2b   : > { %p1488_p1 = pnand %p1486_p2, %p1459_p13 }
  0x2d   : > { %p1489_p6 = pneg %p1488_p1 }
  0x2f   : > { %p1494_p3 = pnand %p1492_p10, %p1489_p6 }
  0x31   : > { %1497 = shalt.err (!%p1494_p3)
}
  0x32   : > { %s1498_s28 = scalar_lea.vmem %s1723_s6, 512  ;;  %p1506_p12 = scmp.lt.s32.totalorder %s1723_s6, %s1723_s6 }
  0x33   : > { %p1499_p5 = scmp.ne.s32.totalorder %s1723_s6, %s1498_s28  ;;  %p1507_p0 = scmp.lt.s32.totalorder %s1498_s28, %s1498_s28 }
  0x35   : > { %p1501_p7 = pnand %p1499_p5, %p1459_p13  ;;  %p1508_p2 = por %p1507_p0, %p1506_p12 }
  0x37   : > { %p1502_p9 = pneg %p1501_p7 }
  0x39   : > { %p1509_p1 = pnand %p1508_p2, %p1502_p9 }
  0x3b   : > { %1512 = shalt.err (!%p1509_p1)
}
  0x3c   : > { %1373 = dma.hbm_to_vmem [thread:$0]  (!%p1719_p11), %s1980_s3, 512, %s1723_s6, [#allocation7], %s1617_s15, %s1617_s15, %s1618_s16  }
  0x3d   : > { %s1778_s14 = sadd.s32 1, %s1613_s21   ;;  %s29_s29 = sadd.s32 1, %s1609_s20 }
  0x3e   : > { %s26_s17 = ssub.s32 %s1613_s21, %s1778_s14  ;;  %p36_p13 = scmp.ne.s32.totalorder %s1609_s20, %s1605_s19 }
  0x3f   : > { %p27_p6 = scmp.eq.s32.totalorder %s26_s17, 0  ;;  %p37_p10 = scmp.eq.s32.totalorder %s1613_s21, 0 }
  0x40   : > { %p1990_p3 = scmp.eq.s32.totalorder %s1689_s22, 1  ;;  %p1384_p7 = scmp.lt.s32.totalorder %s1613_s21, 2 }
  0x41   : > { %s1794_s27 = scalar_select %p27_p6, %s1609_s20, %s29_s29  }
  0x42   : > { %p1788_p5 = por %p1990_p3, %p36_p13  ;;  %p38_p9 = por %p37_p10, %p36_p13 }
  0x43   : > { %s208_s30 = sand.u32 1, %s1609_s20   ;;  %s1229_s6 = sshll.u32 %s1613_s21, 7 }
  0x44   : > { %s1991_s23 = scalar_select %p1788_p5, 1, 0 }
  0x45   : > { %s1228_s7 = sshll.u32 %s208_s30, 3  ;;  %s1801_s8 = scalar_lea.hbm %s1977_s0, %s1229_s6 }
  0x46   : > { %s212_s9 = scalar_lea.vmem [#allocation3], %s1228_s7  ;;  %p1805_p11 = pnand %p1384_p7, %p38_p9 }
  0x47   : > { %s219_s10 = sshll.u32 %s212_s9, 4  ;;  %s209_s28 = scalar_lea.sflag [#allocation4], %s208_s30  ;;  %s1803_s10 = int_to_ptr.vmem [resolvable:$true] %s219_s10 }
  0x48   : > { %s1513_s12 = scalar_lea.hbm %s1801_s8, 128  ;;  %p1515_p0 = pneg %p1805_p11 }
  0x49   : > { %p1514_p12 = scmp.ne.s32.totalorder %s1801_s8, %s1513_s12  ;;  %s1518_s17 = scalar_lea.hbm %s1977_s0, 256 }
  0x4a   : > { %p1519_p13 = scmp.lt.u32.totalorder %s1801_s8, %s1977_s0  ;;  %p1520_p6 = scmp.lt.u32.totalorder %s1518_s17, %s1513_s12 }
  0x4b   : > { %p1516_p2 = pnand %p1515_p0, %p1514_p12  ;;  %p1522_p3 = scmp.lt.u32.totalorder %s1513_s12, %s1801_s8 }
  0x4c   : > { %p1521_p10 = por %p1520_p6, %p1519_p13 }
  0x4d   : > { %p1517_p1 = pneg %p1516_p2 }
  0x4e   : > { %p1523_p7 = por %p1522_p3, %p1521_p10 }
  0x50   : > { %p1524_p9 = pnand %p1523_p7, %p1517_p1 }
  0x52   : > { %1527 = shalt.err (!%p1524_p9)
}
  0x53   : > { %s1528_s30 = scalar_lea.vmem %s1803_s10, 128  ;;  %s1619_s15 = smov [#allocation3]  }
  0x54   : > { %p1529_p12 = scmp.ne.s32.totalorder %s1803_s10, %s1528_s30  ;;  %s1533_s16 = sshll.u32 %s1619_s15, 4  ;;  %s1534_s16 = int_to_ptr.vmem [resolvable:$false] %s1533_s16 }
  0x55   : > { %s1535_s9 = scalar_lea.vmem %s1534_s16, 256  ;;  %p1536_p4 = scmp.lt.s32.totalorder %s1803_s10, %s1534_s16 }
  0x56   : > { %p1531_p2 = pnand %p1529_p12, %p1515_p0  ;;  %p1537_p13 = scmp.lt.s32.totalorder %s1535_s9, %s1528_s30 }
  0x58   : > { %p1532_p5 = pneg %p1531_p2  ;;  %p1538_p6 = por %p1537_p13, %p1536_p4 }
  0x5a   : > { %p1539_p10 = pnand %p1538_p6, %p1532_p5 }
  0x5c   : > { %1542 = shalt.err (!%p1539_p10)
}
  0x5d   : > { %1377 = dma.hbm_to_vmem [thread:$0]  (!%p1805_p11), %s1801_s8, 128, %s1803_s10, %s209_s28  }
  0x5e   : > { %228 = sbr.rel (%p1708_p8) target bundleno = 1764 (0x6e4), region = 40  ;;  %s1837_s12 = sand.u32 (!%p1708_p8), 1, %s1605_s19  }
  0x5f   : > { %s1231_s13 = sshll.u32 (!%p1708_p8), %s1837_s12, 3  ;;  %s231_s29 = scalar_lea.sflag (!%p1708_p8), [#allocation4], %s1837_s12 }
  0x60   : > { %s234_s17 = scalar_lea.vmem (!%p1708_p8), [#allocation3], %s1231_s13  ;;  %p1993_p4 = scmp.ne.s32.totalorder (!%p1708_p8), %s1986_s24, 0 }
  0x65   : > { %1588 = dma.done.wait (%p1993_p4), %s231_s29, 128  }
  0x66   : > { %1590 = vsyncadd (%p1993_p4), %s231_s29, 4294967168  ;;  %p1994_p5 = scmp.eq.s32.totalorder %s1689_s22, 0 }
  0x68   : > { %1592 = dma.done.wait (%p1994_p5), [#allocation7], 1024   ;;  %p1995_p8 = pmov %p1994_p5 }
  0x69   : > { %v1620_v0 = vmov 0.0|0.0   ;;  %vm1621_vm0 = vmmov 0   ;;  %v1622_v1 = vmov 0.0   ;;  %v270_v2 = vld [vmem:[#allocation6] sm:$0xff]  ;;  %v271_v3 = vld [vmem:[#allocation6 + $0x8] sm:$0xff]  ;;  %v272_v4 = vld [vmem:[#allocation6 + $0x10] sm:$0xff] }
  0x6a   : > { %1594 = vsyncadd (%p1995_p8), [#allocation7], 4294966272  ;;  %1343 = vmatprep.subr.bf16.mxu0 %v1620_v0  ;;  %1289 = vmatprep.mubr.msk.f32.mxu0 %vm1621_vm0, %v1622_v1  ;;  %v1344_v5 = vpack.c.bf16 %v271_v3, %v270_v2  ;;  %v273_v6 = vld [vmem:[#allocation6 + $0x18] sm:$0xff]  ;;  %vm281_vm1 = vcmask 261120   ;;  %v1235_v9 = vld [vmem:[%s1979_s2] ss:$0 sm:$0xff] }
  0x6b   : > { %1292 = vmatprep.subr.mxu1 %v1622_v1  ;;  %1294 = vmatprep.mubr.msk.f32.mxu1 %vm1621_vm0, %v1622_v1  ;;  %v1347_v7 = vpack.c.bf16 %v273_v6, %v272_v4  ;;  %v269_v8 = vld [vmem:[%s234_s17] sm:$0xff]  ;;  %s1623_s8 = smov 64   ;;  %s1624_s10 = smov 96   ;;  %vm358_vm2 = vcmask 64512   ;;  %v1035_v2 = vld [vmem:[#allocation8] sm:$0xff]  ;;  %v1036_v3 = vld [vmem:[#allocation8 + $0x8] sm:$0xff] }
  0x6c   : > { %1345 = vmatpush3.bf16.msra.mxu0 %v1344_v5  ;;  %s1625_s11 = smov 88   ;;  %s1626_s28 = smov 120   ;;  %v1037_v4 = vld [vmem:[#allocation8 + $0x10] sm:$0xff]  ;;  %v1038_v5 = vld [vmem:[#allocation8 + $0x18] sm:$0xff]  ;;  %vm690_vm3 = vcmask 130112   ;;  %vm861_vm4 = vcmask 195712  }
  0x6d   : > { %1346 = vmatprep.subr.bf16.mxu0 %v1620_v0  ;;  %s1627_s7 = smov 80   ;;  %s1628_s6 = smov 112   ;;  %vm1032_vm5 = vcmask 261312  }
  0x6e   : > { %s1629_s30 = smov 72   ;;  %s1630_s15 = smov 104  }
  0x6f   : > { %s1631_s16 = smov 56   ;;  %s1632_s9 = smov 40  }
  0x70   : > { %1348 = vmatpush3.bf16.msra.mxu0 %v1347_v7  ;;  %s1633_s29 = smov 48   ;;  %s1634_s17 = smov 8  }
  0x71   : > { %1312 = vmatprep.subr.mxu0 %v1622_v1  ;;  %s1635_s24 = smov 16   ;;  %s1636_s26 = smov 24  }
  0x72   : > { %p1996_p0 = scmp.ne.s32.totalorder %s1991_s23, 0 }
  0x73   : > { %1290 = vmatmul.mubr.msk.f32.vlgmr.msra.gmra.mrb[0].mxu0 %vm281_vm1, %v269_v8  ;;  %v1353_v8 = vpack.c.bf16 %v1038_v5, %v1037_v4 }
  0x74   : > { %1314 = vmatprep.mubr.msk.f32.mxu0 %vm1621_vm0, %v1622_v1 }
 0x146   : > { %v351_v10 = vpop.f32.mrb[0].mxu0 }
 0x147   : > { %v1865_v11 = vadd.f32 %v1235_v9, %v351_v10  ;;  %v1291_v12 = vpop.f32.mrb[1].mxu0 }
 0x149   : > { %442 = vrot.lane.b32.xlu1 %v1865_v11, %s1623_s8  ;;  %356 = vrot.lane.b32.xlu0 %v1865_v11, %s1624_s10 }
 0x14d   : > { %523 = vrot.lane.b32.xlu1 %v1865_v11, %s1625_s11  ;;  %s1252_s11 = sshll.u32 %s1689_s22, 7 }
 0x151   : > { %521 = vrot.lane.b32.xlu1 %v1865_v11, %s1626_s28  ;;  %s268_s28 = scalar_lea.vmem [#allocation9], %s1231_s13  ;;  %s1637_s13 = smov [#allocation9]  }
 0x155   : > { %694 = vrot.lane.b32.xlu1 %v1865_v11, %s1627_s7  ;;  %s1134_s7 = sshll.u32 %s268_s28, 4  ;;  %s1934_s7 = int_to_ptr.vmem [resolvable:$true] %s1134_s7 }
 0x156   : > { %s1543_s22 = scalar_lea.vmem %s1934_s7, 128 }
 0x157   : > { %p1544_p11 = scmp.ne.s32.totalorder %s1934_s7, %s1543_s22 }
 0x159   : > { %692 = vrot.lane.b32.xlu1 %v1865_v11, %s1628_s6  ;;  %p1545_p1 = pnand %p1544_p11, %p1996_p0 }
 0x15b   : > { %p1546_p3 = pneg %p1545_p1 }
 0x15d   : > { %865 = vrot.lane.b32.xlu1 %v1865_v11, %s1629_s30 }
 0x161   : > { %863 = vrot.lane.b32.xlu1 %v1865_v11, %s1630_s15  ;;  %s1932_s15 = scalar_lea.hbm %s1982_s5, %s1252_s11 }
 0x1bb   : > { %v443_v13 = vpop.permute.xlu1 %442  ;;  %v357_v14 = vpop.permute.xlu0 %356 }
 0x1bc   : > { %1293 = vmatpush3.xpose.msk.msra.mxu1 %vm358_vm2, %v357_v14 }
 0x1bd   : > { %1297 = vmatprep.subr.mxu1 %v1622_v1 }
 0x1bf   : > { %v524_v15 = vpop.permute.xlu1 %523  ;;  %1295 = vmatmul.mubr.msk.f32.vlgmr.msra.gmra.mrb[0].mxu1 %vm358_vm2, %v1865_v11 }
 0x1c0   : > { %1298 = vmatpush3.msra.mxu1 %v443_v13  ;;  %1299 = vmatprep.mubr.msk.f32.mxu1 %vm1621_vm0, %v1622_v1 }
 0x1c1   : > { %1302 = vmatprep.subr.mxu1 %v1622_v1 }
 0x1c3   : > { %v522_v16 = vpop.permute.xlu1 %521 }
 0x1c7   : > { %v695_v17 = vpop.permute.xlu1 %694 }
 0x1c8   : > { %1313 = vmatpush3.xpose.msk.msra.mxu0 %vm358_vm2, %v695_v17 }
 0x1c9   : > { %1322 = vmatprep.subr.mxu0 %v1622_v1 }
 0x1cb   : > { %v693_v18 = vpop.permute.xlu1 %692 }
 0x1cc   : > { %1315 = vmatmul.mubr.msk.f32.vlgmr.msra.gmra.mrb[2].mxu0 %vm358_vm2, %v693_v18 }
 0x1cd   : > { %1324 = vmatprep.mubr.msk.f32.mxu0 %vm1621_vm0, %v1622_v1 }
 0x1cf   : > { %v866_v19 = vpop.permute.xlu1 %865 }
 0x1d0   : > { %1323 = vmatpush3.xpose.msk.msra.mxu0 %vm358_vm2, %v866_v19 }
 0x1d1   : > { %1349 = vmatprep.subr.bf16.mxu0 %v1620_v0 }
 0x1d3   : > { %v864_v20 = vpop.permute.xlu1 %863 }
 0x1d4   : > { %1325 = vmatmul.mubr.msk.f32.vlgmr.msra.gmra.mrb[4].mxu0 %vm358_vm2, %v864_v20 }
 0x1d5   : > { %1340 = vmatprep.mubr.msk.f32.mxu0 %vm1621_vm0, %v1622_v1 }
 0x292   : > { %v429_v21 = vpop.f32.mrb[0].mxu1 }
 0x293   : > { %v1296_v22 = vpop.f32.mrb[1].mxu1  ;;  %v433_v23 = vsel %vm358_vm2, %v429_v21, -inf }
 0x294   : > { %434 = vmax.xlane.f32.xlu0 %v433_v23  ;;  %v1249_v22 = vld [vmem:[%s1981_s4] ss:$0 sm:$0xff] }
 0x29f   : > { %v766_v24 = vpop.f32.mrb[2].mxu0 }
 0x2a0   : > { %v1316_v25 = vpop.f32.mrb[3].mxu0  ;;  %v770_v28 = vsel %vm358_vm2, %v766_v24, -inf }
 0x2a7   : > { %v937_v26 = vpop.f32.mrb[4].mxu0 }
 0x2a8   : > { %v1326_v27 = vpop.f32.mrb[5].mxu0  ;;  %v941_v29 = vsel %vm358_vm2, %v937_v26, -inf }
 0x2aa   : > { %608 = vrot.lane.b32.xlu0 %v1865_v11, %s1631_s16  ;;  %s1121_s16 = scalar_lea.sflag [#allocation5], %s1837_s12 }
 0x2c9   : > { %771 = vmax.xlane.f32.xlu0 %v770_v28 }
 0x2cd   : > { %942 = vmax.xlane.f32.xlu0 %v941_v29 }
 0x2e3   : > { %950 = vrot.lane.b32.xlu0 %v1865_v11, %s1632_s9  ;;  %s1547_s9 = sshll.u32 %s1637_s13, 4  ;;  %s1548_s9 = int_to_ptr.vmem [resolvable:$false] %s1547_s9 }
 0x2e4   : > { %p1550_p7 = scmp.lt.s32.totalorder %s1934_s7, %s1548_s9 }
 0x321   : > { %v435_v30 = vpop.xlane.xlu0 %434 }
 0x322   : > { %v436_v31 = vsub.f32 %v429_v21, %v435_v30 }
 0x324   : > { %v437_v32 = vmul.f32 1.442695, %v436_v31 }
 0x325   : > { %v609_v34 = vpop.permute.xlu0 %608 }
 0x326   : > { %1441 = vpow2.f32 %v437_v32 }
 0x330   : > { %v1442_v33 = vpop.eup %1441 }
 0x331   : > { %1300 = vmatmul.mubr.msk.f32.vlgmr.msra.gmra.mrb[2].mxu1 %vm358_vm2, %v1442_v33  ;;  %v439_v57 = vsel %vm358_vm2, %v1442_v33, 0.0 }
 0x332   : > { %1303 = vmatpush3.xpose.msk.msra.mxu1 %vm358_vm2, %v524_v15  ;;  %1304 = vmatprep.mubr.msk.f32.mxu1 %vm1621_vm0, %v1622_v1 }
 0x333   : > { %1307 = vmatprep.subr.mxu1 %v1622_v1 }
 0x335   : > { %1305 = vmatmul.mubr.msk.f32.vlgmr.msra.gmra.mrb[4].mxu1 %vm358_vm2, %v522_v16 }
 0x336   : > { %1308 = vmatpush3.msra.mxu1 %v609_v34  ;;  %1309 = vmatprep.mubr.msk.f32.mxu1 %vm1621_vm0, %v1622_v1 }
 0x337   : > { %1317 = vmatprep.subr.mxu1 %v1622_v1 }
 0x356   : > { %v772_v40 = vpop.xlane.xlu0 %771 }
 0x357   : > { %v773_v41 = vsub.f32 %v766_v24, %v772_v40 }
 0x359   : > { %v774_v42 = vmul.f32 1.442695, %v773_v41 }
 0x35a   : > { %v943_v45 = vpop.xlane.xlu0 %942 }
 0x35b   : > { %1443 = vpow2.f32 %v774_v42  ;;  %v944_v46 = vsub.f32 %v937_v26, %v943_v45 }
 0x35d   : > { %v945_v49 = vmul.f32 1.442695, %v944_v46 }
 0x35e   : > { %v951_v55 = vpop.permute.xlu0 %950 }
 0x365   : > { %v1444_v43 = vpop.eup %1443 }
 0x366   : > { %v776_v44 = vsel %vm358_vm2, %v1444_v43, 0.0 }
 0x404   : > { %v514_v35 = vpop.f32.mrb[2].mxu1 }
 0x405   : > { %v1301_v36 = vpop.f32.mrb[3].mxu1 }
 0x408   : > { %v595_v37 = vpop.f32.mrb[4].mxu1 }
 0x409   : > { %v1306_v38 = vpop.f32.mrb[5].mxu1  ;;  %v599_v39 = vsel %vm358_vm2, %v595_v37, -inf }
 0x40a   : > { %600 = vmax.xlane.f32.xlu1 %v599_v39 }
 0x41b   : > { %779 = vrot.lane.b32.xlu1 %v1865_v11, %s1633_s29  ;;  %s1549_s29 = scalar_lea.vmem %s1548_s9, 256 }
 0x41c   : > { %p1551_p9 = scmp.lt.s32.totalorder %s1549_s29, %s1543_s22 }
 0x41e   : > { %p1552_p12 = por %p1551_p9, %p1550_p7 }
 0x420   : > { %p1553_p2 = pnand %p1552_p12, %p1546_p3 }
 0x43f   : > { %777 = vadd.xlane.f32.xlu1 %v776_v44 }
 0x497   : > { %v601_v47 = vpop.xlane.xlu1 %600 }
 0x498   : > { %v602_v48 = vsub.f32 %v595_v37, %v601_v47 }
 0x49a   : > { %v603_v50 = vmul.f32 1.442695, %v602_v48 }
 0x49b   : > { %v780_v52 = vpop.permute.xlu1 %779 }
 0x49c   : > { %1445 = vpow2.f32 %v603_v50 }
 0x49d   : > { %1447 = vpow2.f32 %v945_v49 }
 0x4a6   : > { %v1446_v51 = vpop.eup %1445 }
 0x4a7   : > { %1310 = vmatmul.mubr.msk.f32.vlgmr.msra.gmra.mrb[6].mxu1 %vm358_vm2, %v1446_v51  ;;  %v605_v53 = vsel %vm358_vm2, %v1446_v51, 0.0  ;;  %v1448_v54 = vpop.eup %1447 }
 0x4a8   : > { %1318 = vmatpush3.msra.mxu1 %v780_v52  ;;  %606 = vadd.xlane.f32.xlu0 %v605_v53  ;;  %v947_v56 = vsel %vm358_vm2, %v1448_v54, 0.0 }
 0x4a9   : > { %1319 = vmatprep.mubr.msk.f32.mxu1 %vm1621_vm0, %v1622_v1  ;;  %1327 = vmatprep.subr.mxu1 %v1622_v1 }
 0x4ab   : > { %1320 = vmatmul.mubr.msk.f32.vlgmr.msra.gmra.mrb[8].mxu1 %vm358_vm2, %v1444_v43 }
 0x4ac   : > { %1328 = vmatpush3.msra.mxu1 %v951_v55  ;;  %948 = vadd.xlane.f32.xlu0 %v947_v56 }
 0x4ad   : > { %1329 = vmatprep.mubr.msk.f32.mxu1 %vm1621_vm0, %v1622_v1  ;;  %v1350_v1 = vpack.c.bf16 %v1036_v3, %v1035_v2 }
 0x4af   : > { %1330 = vmatmul.mubr.msk.f32.vlgmr.msra.gmra.mrb[10].mxu1 %vm358_vm2, %v1448_v54  ;;  %1351 = vmatpush3.bf16.msra.mxu0 %v1350_v1 }
 0x4b0   : > { %440 = vadd.xlane.f32.xlu0 %v439_v57  ;;  %1352 = vmatprep.subr.bf16.mxu0 %v1620_v0 }
 0x4b3   : > { %1354 = vmatpush3.bf16.msra.mxu0 %v1353_v8 }
 0x4cc   : > { %v778_v63 = vpop.xlane.xlu1 %777 }
 0x535   : > { %v607_v58 = vpop.xlane.xlu0 %606 }
 0x539   : > { %v949_v59 = vpop.xlane.xlu0 %948 }
 0x53d   : > { %v441_v60 = vpop.xlane.xlu0 %440 }
 0x53e   : > { %1449 = vrcp.f32 %v441_v60 }
 0x53f   : > { %1451 = vrcp.f32 %v607_v58 }
 0x540   : > { %1453 = vrcp.f32 %v778_v63 }
 0x541   : > { %1455 = vrcp.f32 %v949_v59 }
 0x548   : > { %v1450_v61 = vpop.eup %1449 }
 0x549   : > { %v519_v62 = vmul.f32 %v1450_v61, %v514_v35  ;;  %v1452_v6 = vpop.eup %1451 }
 0x54a   : > { %v1454_v11 = vpop.eup %1453 }
 0x54b   : > { %520 = vst.msk [vmem:[#allocation2] sm:$0xff] %vm358_vm2, %v519_v62  ;;  %v1456_v15 = vpop.eup %1455 }
 0x57a   : > { %v680_v7 = vpop.f32.mrb[6].mxu1 }
 0x57b   : > { %v685_v9 = vmul.f32 %v1452_v6, %v680_v7  ;;  %v1311_v10 = vpop.f32.mrb[7].mxu1 }
 0x57d   : > { %687 = vrot.lane.b32.xlu0 %v685_v9, %s1634_s17 }
 0x57e   : > { %v851_v12 = vpop.f32.mrb[8].mxu1 }
 0x57f   : > { %v856_v13 = vmul.f32 %v1454_v11, %v851_v12  ;;  %v1321_v14 = vpop.f32.mrb[9].mxu1 }
 0x581   : > { %858 = vrot.lane.b32.xlu1 %v856_v13, %s1635_s24 }
 0x582   : > { %v1022_v16 = vpop.f32.mrb[10].mxu1 }
 0x583   : > { %v1027_v17 = vmul.f32 %v1456_v15, %v1022_v16  ;;  %v1331_v18 = vpop.f32.mrb[11].mxu1 }
 0x585   : > { %1029 = vrot.lane.b32.xlu0 %v1027_v17, %s1636_s26 }
 0x5ef   : > { %v688_v19 = vpop.permute.xlu0 %687 }
 0x5f0   : > { %691 = vst.msk [vmem:[#allocation2] sm:$0xff] %vm690_vm3, %v688_v19 }
 0x5f3   : > { %v859_v0 = vpop.permute.xlu1 %858 }
 0x5f4   : > { %862 = vst.msk [vmem:[#allocation2] sm:$0xff] %vm861_vm4, %v859_v0 }
 0x5f7   : > { %v1030_v20 = vpop.permute.xlu0 %1029 }
 0x5f8   : > { %1033 = vst.msk [vmem:[#allocation2] sm:$0xff] %vm1032_vm5, %v1030_v20 }
 0x5ff   : > { %v1034_v21 = vld [vmem:[#allocation2] sm:$0xff] }
 0x600   : > { %1341 = vmatmul.mubr.msk.f32.vlgmr.msra.gmra.mrb[6].mxu0 %vm281_vm1, %v1034_v21 }
 0x6d3   : > { %v1115_v23 = vpop.f32.mrb[6].mxu0 }
 0x6d4   : > { %v1116_v24 = vadd.f32 %v1249_v22, %v1115_v23  ;;  %v1342_v25 = vpop.f32.mrb[7].mxu0 }
 0x6d6   : > { %1119 = vst.msk [vmem:[%s268_s28] sm:$0xff] %vm281_vm1, %v1116_v24 }
 0x6d7   : > { %1556 = shalt.err (!%p1553_p2)
}
 0x6d8   : > { %s1557_s12 = scalar_lea.hbm %s1932_s15, 128  ;;  %s1561_s26 = scalar_lea.hbm %s1982_s5, 256 }
 0x6d9   : > { %p1558_p13 = scmp.ne.s32.totalorder %s1932_s15, %s1557_s12  ;;  %p1562_p4 = scmp.lt.u32.totalorder %s1932_s15, %s1982_s5 }
 0x6da   : > { %p1563_p5 = scmp.lt.u32.totalorder %s1561_s26, %s1557_s12  ;;  %p1565_p11 = scmp.lt.u32.totalorder %s1557_s12, %s1932_s15 }
 0x6db   : > { %p1559_p6 = pnand %p1558_p13, %p1996_p0 }
 0x6dc   : > { %p1564_p8 = por %p1563_p5, %p1562_p4 }
 0x6dd   : > { %p1560_p10 = pneg %p1559_p6 }
 0x6de   : > { %p1566_p1 = por %p1565_p11, %p1564_p8 }
 0x6e0   : > { %p1567_p3 = pnand %p1566_p1, %p1560_p10 }
 0x6e2   : > { %1570 = shalt.err (!%p1567_p3)
}
 0x6e3   : > { %1365 = dma.vmem_to_hbm [thread:$0]  (%p1996_p0), %s1934_s7, 128, %s1932_s15, %s1121_s16  }
 0x6e4 PF: > { %s1146_s11 = sand.u32 1, %s1601_s18   ;;  %p1997_p7 = scmp.ne.s32.totalorder %s1987_s25, 0 }
 0x6e5   : > { %p1998_p9 = scmp.ge.s32.totalorder %s1613_s21, 2  ;;  %s1147_s28 = scalar_lea.sflag [#allocation5], %s1146_s11 }
 0x6e7   : > { %p1379_p12 = pnand %p1998_p9, %p1997_p7 }
 0x6e9   : > { %1596 = dma.done.wait (!%p1379_p12), %s1147_s28, 128  }
 0x6ea   : > { %1598 = vsyncadd (!%p1379_p12), %s1147_s28, 4294967168  ;;  %p19_p2 = scmp.ge.s32.totalorder %s1778_s14, 4   ;;  %s1999_s18 = smov %s1605_s19 }
 0x6eb   : > { %s2000_s19 = smov %s1609_s20  ;;  %s2001_s20 = smov %s1794_s27 }
 0x6ec   : > { %s2002_s21 = smov %s1778_s14  ;;  %21 = sbr.rel (!%p19_p2) target bundleno = 6 (0x6), region = 93 }
 0x6f3   :  { %1152 = vsyncpa [#allocation4], 1 }
 0x6f4   :  { %1154 = vsyncpa [#allocation4 + $0x1], 1 }
 0x6f5   :  { %1155 = vsyncpa [#allocation7], 1 }
 0x6f6   :  { %1156 = vsyncpa [#allocation5], 1 }
 0x6f7   :  { %1158 = vsyncpa [#allocation5 + $0x1], 1 }

</bundles_post_ra>
